<compile_context>
chip_gen: v7x
topology: tpu7x:2x2x1
jax: 0.10.0
libtpu: 0.0.40
codegen_flags: <defaults>
</compile_context>

<pallas_src>
import jax
import jax.numpy as jnp
from jax.experimental import pallas as pl
from jax.experimental.pallas import tpu as pltpu

IN_FEATURES = 3
OUT_FEATURES = 11


def _round_up(x, m):
    return ((x + m - 1) // m) * m


def _tile_params():
    """Per-generation batch-tile cap and explicit scoped-VMEM limit.

    Double-buffered block footprint is ~192*tb bytes:
      x  block (3,tb)  f32 padded to 8 sublanes  -> 32*tb x 2 bufs
      out block (11,tb) f32 padded to 16 sublanes -> 64*tb x 2 bufs
    """
    try:
        kind = jax.devices()[0].device_kind.lower()
    except Exception:  # pragma: no cover - defensive
        kind = ""
    if "v5 lite" in kind or "v5e" in kind or "v5litepod" in kind:
        # v5e: 16 MiB scoped-VMEM default; tb=32768 -> ~6 MiB of blocks.
        return 32768, None
    # v6e / v7x (and anything newer/unknown): ~24 MiB of blocks at tb=131072,
    # under an explicit 32 MiB scoped budget (v7x physical VMEM is 64 MiB).
    return 131072, 32 * 1024 * 1024


def _linear_kernel(w_ref, x_ref, o_ref):
    # w_ref: (33,)     f32 SMEM  -- flattened (11, 3) weight, scalar-prefetched.
    # x_ref: (3, TB)   f32 VMEM  -- lane-dense batch tile (features on sublanes).
    # o_ref: (11, TB)  f32 VMEM  -- lane-dense output tile.
    x0 = x_ref[0, :]
    x1 = x_ref[1, :]
    x2 = x_ref[2, :]
    for f in range(OUT_FEATURES):  # fully unrolled, 11 scalar-splat FMAs each
        o_ref[f, :] = (
            w_ref[3 * f + 0] * x0
            + w_ref[3 * f + 1] * x1
            + w_ref[3 * f + 2] * x2
        )


def net1_forward_fm(xT, weight):
    """Feature-major forward: xT (3, B), weight (11, 3) -> (11, B).

    This is the preferred contract (propagate the feature-major layout to the
    producer/consumer): no transposes, minimal HBM traffic (~56 B/row).
    """
    K, B = xT.shape
    assert K == IN_FEATURES
    assert weight.shape == (OUT_FEATURES, IN_FEATURES)

    xT = xT.astype(jnp.float32)
    w_flat = weight.astype(jnp.float32).reshape(-1)  # (33,) -> SMEM prefetch

    if B < 128:
        # Too small for a lane-dense tile; the kernel would be pure overhead.
        return weight.astype(jnp.float32) @ xT

    tb_max, vmem_limit = _tile_params()
    # Aim for >= 2 grid steps so v7x's two TensorCores both engage and DMA
    # pipelines with compute; cap by the per-generation VMEM budget.
    tb = max(128, _round_up((B + 1) // 2, 128))
    tb = min(tb, tb_max, _round_up(B, 128))
    grid = (pl.cdiv(B, tb),)

    cost = pl.CostEstimate(
        flops=2 * IN_FEATURES * OUT_FEATURES * B,
        transcendentals=0,
        bytes_accessed=(IN_FEATURES + OUT_FEATURES) * 4 * B,
    )

    outT = pl.pallas_call(
        _linear_kernel,
        out_shape=jax.ShapeDtypeStruct((OUT_FEATURES, B), jnp.float32),
        grid_spec=pltpu.PrefetchScalarGridSpec(
            num_scalar_prefetch=1,          # weight -> SMEM, passed first
            grid=grid,
            in_specs=[
                # x: (3, tb) lane-dense tile marching along the batch axis.
                pl.BlockSpec((IN_FEATURES, tb), lambda i, w: (0, i)),
            ],
            out_specs=pl.BlockSpec((OUT_FEATURES, tb), lambda i, w: (0, i)),
        ),
        compiler_params=pltpu.CompilerParams(
            dimension_semantics=("parallel",),  # batch axis across TCs (v7x)
            vmem_limit_bytes=vmem_limit,
        ),
        cost_estimate=cost,
    )(w_flat, xT)

    return outT  # (11, B)


def net1_forward(x, weight, *, min_pallas_batch=4096):
    """PyTorch-layout contract: x (B, 3) -> (B, 11) == x @ weight.T.

    The batch-major contract forces (B,3)->(3,B) and (11,B)->(B,11) transposes
    around the lane-dense kernel (~3x HBM traffic, 2 extra launches), so for
    B < min_pallas_batch we let XLA's single fused broadcast-FMA pass handle it.
    Prefer net1_forward_fm when the surrounding code can carry the
    (features, batch) layout.
    """
    B = x.shape[0]
    x = x.astype(jnp.float32)
    weight = weight.astype(jnp.float32)
    if B < min_pallas_batch:
        return x @ weight.T
    return net1_forward_fm(x.T, weight).T


if __name__ == "__main__":
    key = jax.random.PRNGKey(0)
    kx, kw, kx2 = jax.random.split(key, 3)

    # Module spec: nn.init.constant_(self.fc1.weight, 0.0) -> all-zeros (11, 3).
    weight_zero = jnp.zeros((OUT_FEATURES, IN_FEATURES), dtype=jnp.float32)
    weight_rand = jax.random.normal(kw, (OUT_FEATURES, IN_FEATURES), dtype=jnp.float32)

    # --- Feature-major (preferred, transpose-free) kernel path -------------
    B = 256
    xT = jax.random.normal(kx, (IN_FEATURES, B), dtype=jnp.float32)

    outT = net1_forward_fm(xT, weight_zero)
    jax.block_until_ready(outT)
    assert outT.shape == (OUT_FEATURES, B)
    assert jnp.allclose(outT, weight_zero @ xT, atol=1e-6)

    outT2 = net1_forward_fm(xT, weight_rand)
    jax.block_until_ready(outT2)
    assert jnp.allclose(outT2, weight_rand @ xT, atol=1e-5, rtol=1e-5)

    # --- Non-multiple-of-128 batch: partial trailing block clipping --------
    B2 = 200
    xT3 = jax.random.normal(kx2, (IN_FEATURES, B2), dtype=jnp.float32)
    outT3 = net1_forward_fm(xT3, weight_rand)
    jax.block_until_ready(outT3)
    assert outT3.shape == (OUT_FEATURES, B2)
    assert jnp.allclose(outT3, weight_rand @ xT3, atol=1e-5, rtol=1e-5)

    # --- Batch-major compatibility contract (PyTorch layout) ---------------
    x_bm = xT.T  # (B, 3)
    # Small B normally takes the fused XLA path; force the kernel path once to
    # validate the transposed plumbing as well.
    out_bm = net1_forward(x_bm, weight_rand, min_pallas_batch=0)
    jax.block_until_ready(out_bm)
    assert out_bm.shape == (B, OUT_FEATURES)
    assert jnp.allclose(out_bm, x_bm @ weight_rand.T, atol=1e-5, rtol=1e-5)

    out_bm_xla = net1_forward(x_bm, weight_rand)  # default gate -> XLA fallback
    jax.block_until_ready(out_bm_xla)
    assert jnp.allclose(out_bm_xla, x_bm @ weight_rand.T, atol=1e-5, rtol=1e-5)

    print("KERNEL_OK")
</pallas_src>

<mosaic_0001>
module attributes {stable_mosaic.version = 11 : i64} {
  func.func @_linear_kernel(%arg0: i32, %arg1: memref<33xf32, #tpu.memory_space<smem>>, %arg2: memref<3x128xf32, #tpu.memory_space<vmem>>, %arg3: memref<11x128xf32, #tpu.memory_space<vmem>>) attributes {dimension_semantics = [#tpu.dimension_semantics<parallel>], iteration_bounds = array<i64: 2>, scalar_prefetch = 1 : i64, scratch_operands = 0 : i64, tpu.core_type = #tpu.core_type<tc>, window_params = [{transform_indices = @transform_0, window_bounds = array<i64: 3, 128>}, {transform_indices = @transform_1, window_bounds = array<i64: 11, 128>}]} {
    %c0 = arith.constant 0 : index
    %c0_0 = arith.constant 0 : index
    %0 = vector.load %arg2[%c0, %c0_0] : memref<3x128xf32, #tpu.memory_space<vmem>>, vector<1x128xf32>
    %1 = vector.shape_cast %0 : vector<1x128xf32> to vector<128xf32>
    %c1 = arith.constant 1 : index
    %c0_1 = arith.constant 0 : index
    %2 = vector.load %arg2[%c1, %c0_1] : memref<3x128xf32, #tpu.memory_space<vmem>>, vector<1x128xf32>
    %3 = vector.shape_cast %2 : vector<1x128xf32> to vector<128xf32>
    %c2 = arith.constant 2 : index
    %c0_2 = arith.constant 0 : index
    %4 = vector.load %arg2[%c2, %c0_2] : memref<3x128xf32, #tpu.memory_space<vmem>>, vector<1x128xf32>
    %5 = vector.shape_cast %4 : vector<1x128xf32> to vector<128xf32>
    %c0_3 = arith.constant 0 : index
    %6 = memref.load %arg1[%c0_3] : memref<33xf32, #tpu.memory_space<smem>>
    %7 = vector.broadcast %6 : f32 to vector<128xf32>
    %8 = arith.mulf %7, %1 : vector<128xf32>
    %c1_4 = arith.constant 1 : index
    %9 = memref.load %arg1[%c1_4] : memref<33xf32, #tpu.memory_space<smem>>
    %10 = vector.broadcast %9 : f32 to vector<128xf32>
    %11 = arith.mulf %10, %3 : vector<128xf32>
    %12 = arith.addf %8, %11 : vector<128xf32>
    %c2_5 = arith.constant 2 : index
    %13 = memref.load %arg1[%c2_5] : memref<33xf32, #tpu.memory_space<smem>>
    %14 = vector.broadcast %13 : f32 to vector<128xf32>
    %15 = arith.mulf %14, %5 : vector<128xf32>
    %16 = arith.addf %12, %15 : vector<128xf32>
    %c0_6 = arith.constant 0 : index
    %c0_7 = arith.constant 0 : index
    %17 = vector.load %arg3[%c0_6, %c0_7] : memref<11x128xf32, #tpu.memory_space<vmem>>, vector<1x128xf32>
    %18 = vector.shape_cast %17 : vector<1x128xf32> to vector<128xf32>
    %19 = vector.shape_cast %16 : vector<128xf32> to vector<1x128xf32>
    tpu.vector_store %arg3[%c0_6, %c0_7], %19 {strides = array<i32>} : memref<11x128xf32, #tpu.memory_space<vmem>>, vector<1x128xf32>,
    %c3 = arith.constant 3 : index
    %20 = memref.load %arg1[%c3] : memref<33xf32, #tpu.memory_space<smem>>
    %21 = vector.broadcast %20 : f32 to vector<128xf32>
    %22 = arith.mulf %21, %1 : vector<128xf32>
    %c4 = arith.constant 4 : index
    %23 = memref.load %arg1[%c4] : memref<33xf32, #tpu.memory_space<smem>>
    %24 = vector.broadcast %23 : f32 to vector<128xf32>
    %25 = arith.mulf %24, %3 : vector<128xf32>
    %26 = arith.addf %22, %25 : vector<128xf32>
    %c5 = arith.constant 5 : index
    %27 = memref.load %arg1[%c5] : memref<33xf32, #tpu.memory_space<smem>>
    %28 = vector.broadcast %27 : f32 to vector<128xf32>
    %29 = arith.mulf %28, %5 : vector<128xf32>
    %30 = arith.addf %26, %29 : vector<128xf32>
    %c1_8 = arith.constant 1 : index
    %c0_9 = arith.constant 0 : index
    %31 = vector.load %arg3[%c1_8, %c0_9] : memref<11x128xf32, #tpu.memory_space<vmem>>, vector<1x128xf32>
    %32 = vector.shape_cast %31 : vector<1x128xf32> to vector<128xf32>
    %33 = vector.shape_cast %30 : vector<128xf32> to vector<1x128xf32>
    tpu.vector_store %arg3[%c1_8, %c0_9], %33 {strides = array<i32>} : memref<11x128xf32, #tpu.memory_space<vmem>>, vector<1x128xf32>,
    %c6 = arith.constant 6 : index
    %34 = memref.load %arg1[%c6] : memref<33xf32, #tpu.memory_space<smem>>
    %35 = vector.broadcast %34 : f32 to vector<128xf32>
    %36 = arith.mulf %35, %1 : vector<128xf32>
    %c7 = arith.constant 7 : index
    %37 = memref.load %arg1[%c7] : memref<33xf32, #tpu.memory_space<smem>>
    %38 = vector.broadcast %37 : f32 to vector<128xf32>
    %39 = arith.mulf %38, %3 : vector<128xf32>
    %40 = arith.addf %36, %39 : vector<128xf32>
    %c8 = arith.constant 8 : index
    %41 = memref.load %arg1[%c8] : memref<33xf32, #tpu.memory_space<smem>>
    %42 = vector.broadcast %41 : f32 to vector<128xf32>
    %43 = arith.mulf %42, %5 : vector<128xf32>
    %44 = arith.addf %40, %43 : vector<128xf32>
    %c2_10 = arith.constant 2 : index
    %c0_11 = arith.constant 0 : index
    %45 = vector.load %arg3[%c2_10, %c0_11] : memref<11x128xf32, #tpu.memory_space<vmem>>, vector<1x128xf32>
    %46 = vector.shape_cast %45 : vector<1x128xf32> to vector<128xf32>
    %47 = vector.shape_cast %44 : vector<128xf32> to vector<1x128xf32>
    tpu.vector_store %arg3[%c2_10, %c0_11], %47 {strides = array<i32>} : memref<11x128xf32, #tpu.memory_space<vmem>>, vector<1x128xf32>,
    %c9 = arith.constant 9 : index
    %48 = memref.load %arg1[%c9] : memref<33xf32, #tpu.memory_space<smem>>
    %49 = vector.broadcast %48 : f32 to vector<128xf32>
    %50 = arith.mulf %49, %1 : vector<128xf32>
    %c10 = arith.constant 10 : index
    %51 = memref.load %arg1[%c10] : memref<33xf32, #tpu.memory_space<smem>>
    %52 = vector.broadcast %51 : f32 to vector<128xf32>
    %53 = arith.mulf %52, %3 : vector<128xf32>
    %54 = arith.addf %50, %53 : vector<128xf32>
    %c11 = arith.constant 11 : index
    %55 = memref.load %arg1[%c11] : memref<33xf32, #tpu.memory_space<smem>>
    %56 = vector.broadcast %55 : f32 to vector<128xf32>
    %57 = arith.mulf %56, %5 : vector<128xf32>
    %58 = arith.addf %54, %57 : vector<128xf32>
    %c3_12 = arith.constant 3 : index
    %c0_13 = arith.constant 0 : index
    %59 = vector.load %arg3[%c3_12, %c0_13] : memref<11x128xf32, #tpu.memory_space<vmem>>, vector<1x128xf32>
    %60 = vector.shape_cast %59 : vector<1x128xf32> to vector<128xf32>
    %61 = vector.shape_cast %58 : vector<128xf32> to vector<1x128xf32>
    tpu.vector_store %arg3[%c3_12, %c0_13], %61 {strides = array<i32>} : memref<11x128xf32, #tpu.memory_space<vmem>>, vector<1x128xf32>,
    %c12 = arith.constant 12 : index
    %62 = memref.load %arg1[%c12] : memref<33xf32, #tpu.memory_space<smem>>
    %63 = vector.broadcast %62 : f32 to vector<128xf32>
    %64 = arith.mulf %63, %1 : vector<128xf32>
    %c13 = arith.constant 13 : index
    %65 = memref.load %arg1[%c13] : memref<33xf32, #tpu.memory_space<smem>>
    %66 = vector.broadcast %65 : f32 to vector<128xf32>
    %67 = arith.mulf %66, %3 : vector<128xf32>
    %68 = arith.addf %64, %67 : vector<128xf32>
    %c14 = arith.constant 14 : index
    %69 = memref.load %arg1[%c14] : memref<33xf32, #tpu.memory_space<smem>>
    %70 = vector.broadcast %69 : f32 to vector<128xf32>
    %71 = arith.mulf %70, %5 : vector<128xf32>
    %72 = arith.addf %68, %71 : vector<128xf32>
    %c4_14 = arith.constant 4 : index
    %c0_15 = arith.constant 0 : index
    %73 = vector.load %arg3[%c4_14, %c0_15] : memref<11x128xf32, #tpu.memory_space<vmem>>, vector<1x128xf32>
    %74 = vector.shape_cast %73 : vector<1x128xf32> to vector<128xf32>
    %75 = vector.shape_cast %72 : vector<128xf32> to vector<1x128xf32>
    tpu.vector_store %arg3[%c4_14, %c0_15], %75 {strides = array<i32>} : memref<11x128xf32, #tpu.memory_space<vmem>>, vector<1x128xf32>,
    %c15 = arith.constant 15 : index
    %76 = memref.load %arg1[%c15] : memref<33xf32, #tpu.memory_space<smem>>
    %77 = vector.broadcast %76 : f32 to vector<128xf32>
    %78 = arith.mulf %77, %1 : vector<128xf32>
    %c16 = arith.constant 16 : index
    %79 = memref.load %arg1[%c16] : memref<33xf32, #tpu.memory_space<smem>>
    %80 = vector.broadcast %79 : f32 to vector<128xf32>
    %81 = arith.mulf %80, %3 : vector<128xf32>
    %82 = arith.addf %78, %81 : vector<128xf32>
    %c17 = arith.constant 17 : index
    %83 = memref.load %arg1[%c17] : memref<33xf32, #tpu.memory_space<smem>>
    %84 = vector.broadcast %83 : f32 to vector<128xf32>
    %85 = arith.mulf %84, %5 : vector<128xf32>
    %86 = arith.addf %82, %85 : vector<128xf32>
    %c5_16 = arith.constant 5 : index
    %c0_17 = arith.constant 0 : index
    %87 = vector.load %arg3[%c5_16, %c0_17] : memref<11x128xf32, #tpu.memory_space<vmem>>, vector<1x128xf32>
    %88 = vector.shape_cast %87 : vector<1x128xf32> to vector<128xf32>
    %89 = vector.shape_cast %86 : vector<128xf32> to vector<1x128xf32>
    tpu.vector_store %arg3[%c5_16, %c0_17], %89 {strides = array<i32>} : memref<11x128xf32, #tpu.memory_space<vmem>>, vector<1x128xf32>,
    %c18 = arith.constant 18 : index
    %90 = memref.load %arg1[%c18] : memref<33xf32, #tpu.memory_space<smem>>
    %91 = vector.broadcast %90 : f32 to vector<128xf32>
    %92 = arith.mulf %91, %1 : vector<128xf32>
    %c19 = arith.constant 19 : index
    %93 = memref.load %arg1[%c19] : memref<33xf32, #tpu.memory_space<smem>>
    %94 = vector.broadcast %93 : f32 to vector<128xf32>
    %95 = arith.mulf %94, %3 : vector<128xf32>
    %96 = arith.addf %92, %95 : vector<128xf32>
    %c20 = arith.constant 20 : index
    %97 = memref.load %arg1[%c20] : memref<33xf32, #tpu.memory_space<smem>>
    %98 = vector.broadcast %97 : f32 to vector<128xf32>
    %99 = arith.mulf %98, %5 : vector<128xf32>
    %100 = arith.addf %96, %99 : vector<128xf32>
    %c6_18 = arith.constant 6 : index
    %c0_19 = arith.constant 0 : index
    %101 = vector.load %arg3[%c6_18, %c0_19] : memref<11x128xf32, #tpu.memory_space<vmem>>, vector<1x128xf32>
    %102 = vector.shape_cast %101 : vector<1x128xf32> to vector<128xf32>
    %103 = vector.shape_cast %100 : vector<128xf32> to vector<1x128xf32>
    tpu.vector_store %arg3[%c6_18, %c0_19], %103 {strides = array<i32>} : memref<11x128xf32, #tpu.memory_space<vmem>>, vector<1x128xf32>,
    %c21 = arith.constant 21 : index
    %104 = memref.load %arg1[%c21] : memref<33xf32, #tpu.memory_space<smem>>
    %105 = vector.broadcast %104 : f32 to vector<128xf32>
    %106 = arith.mulf %105, %1 : vector<128xf32>
    %c22 = arith.constant 22 : index
    %107 = memref.load %arg1[%c22] : memref<33xf32, #tpu.memory_space<smem>>
    %108 = vector.broadcast %107 : f32 to vector<128xf32>
    %109 = arith.mulf %108, %3 : vector<128xf32>
    %110 = arith.addf %106, %109 : vector<128xf32>
    %c23 = arith.constant 23 : index
    %111 = memref.load %arg1[%c23] : memref<33xf32, #tpu.memory_space<smem>>
    %112 = vector.broadcast %111 : f32 to vector<128xf32>
    %113 = arith.mulf %112, %5 : vector<128xf32>
    %114 = arith.addf %110, %113 : vector<128xf32>
    %c7_20 = arith.constant 7 : index
    %c0_21 = arith.constant 0 : index
    %115 = vector.load %arg3[%c7_20, %c0_21] : memref<11x128xf32, #tpu.memory_space<vmem>>, vector<1x128xf32>
    %116 = vector.shape_cast %115 : vector<1x128xf32> to vector<128xf32>
    %117 = vector.shape_cast %114 : vector<128xf32> to vector<1x128xf32>
    tpu.vector_store %arg3[%c7_20, %c0_21], %117 {strides = array<i32>} : memref<11x128xf32, #tpu.memory_space<vmem>>, vector<1x128xf32>,
    %c24 = arith.constant 24 : index
    %118 = memref.load %arg1[%c24] : memref<33xf32, #tpu.memory_space<smem>>
    %119 = vector.broadcast %118 : f32 to vector<128xf32>
    %120 = arith.mulf %119, %1 : vector<128xf32>
    %c25 = arith.constant 25 : index
    %121 = memref.load %arg1[%c25] : memref<33xf32, #tpu.memory_space<smem>>
    %122 = vector.broadcast %121 : f32 to vector<128xf32>
    %123 = arith.mulf %122, %3 : vector<128xf32>
    %124 = arith.addf %120, %123 : vector<128xf32>
    %c26 = arith.constant 26 : index
    %125 = memref.load %arg1[%c26] : memref<33xf32, #tpu.memory_space<smem>>
    %126 = vector.broadcast %125 : f32 to vector<128xf32>
    %127 = arith.mulf %126, %5 : vector<128xf32>
    %128 = arith.addf %124, %127 : vector<128xf32>
    %c8_22 = arith.constant 8 : index
    %c0_23 = arith.constant 0 : index
    %129 = vector.load %arg3[%c8_22, %c0_23] : memref<11x128xf32, #tpu.memory_space<vmem>>, vector<1x128xf32>
    %130 = vector.shape_cast %129 : vector<1x128xf32> to vector<128xf32>
    %131 = vector.shape_cast %128 : vector<128xf32> to vector<1x128xf32>
    tpu.vector_store %arg3[%c8_22, %c0_23], %131 {strides = array<i32>} : memref<11x128xf32, #tpu.memory_space<vmem>>, vector<1x128xf32>,
    %c27 = arith.constant 27 : index
    %132 = memref.load %arg1[%c27] : memref<33xf32, #tpu.memory_space<smem>>
    %133 = vector.broadcast %132 : f32 to vector<128xf32>
    %134 = arith.mulf %133, %1 : vector<128xf32>
    %c28 = arith.constant 28 : index
    %135 = memref.load %arg1[%c28] : memref<33xf32, #tpu.memory_space<smem>>
    %136 = vector.broadcast %135 : f32 to vector<128xf32>
    %137 = arith.mulf %136, %3 : vector<128xf32>
    %138 = arith.addf %134, %137 : vector<128xf32>
    %c29 = arith.constant 29 : index
    %139 = memref.load %arg1[%c29] : memref<33xf32, #tpu.memory_space<smem>>
    %140 = vector.broadcast %139 : f32 to vector<128xf32>
    %141 = arith.mulf %140, %5 : vector<128xf32>
    %142 = arith.addf %138, %141 : vector<128xf32>
    %c9_24 = arith.constant 9 : index
    %c0_25 = arith.constant 0 : index
    %143 = vector.load %arg3[%c9_24, %c0_25] : memref<11x128xf32, #tpu.memory_space<vmem>>, vector<1x128xf32>
    %144 = vector.shape_cast %143 : vector<1x128xf32> to vector<128xf32>
    %145 = vector.shape_cast %142 : vector<128xf32> to vector<1x128xf32>
    tpu.vector_store %arg3[%c9_24, %c0_25], %145 {strides = array<i32>} : memref<11x128xf32, #tpu.memory_space<vmem>>, vector<1x128xf32>,
    %c30 = arith.constant 30 : index
    %146 = memref.load %arg1[%c30] : memref<33xf32, #tpu.memory_space<smem>>
    %147 = vector.broadcast %146 : f32 to vector<128xf32>
    %148 = arith.mulf %147, %1 : vector<128xf32>
    %c31 = arith.constant 31 : index
    %149 = memref.load %arg1[%c31] : memref<33xf32, #tpu.memory_space<smem>>
    %150 = vector.broadcast %149 : f32 to vector<128xf32>
    %151 = arith.mulf %150, %3 : vector<128xf32>
    %152 = arith.addf %148, %151 : vector<128xf32>
    %c32 = arith.constant 32 : index
    %153 = memref.load %arg1[%c32] : memref<33xf32, #tpu.memory_space<smem>>
    %154 = vector.broadcast %153 : f32 to vector<128xf32>
    %155 = arith.mulf %154, %5 : vector<128xf32>
    %156 = arith.addf %152, %155 : vector<128xf32>
    %c10_26 = arith.constant 10 : index
    %c0_27 = arith.constant 0 : index
    %157 = vector.load %arg3[%c10_26, %c0_27] : memref<11x128xf32, #tpu.memory_space<vmem>>, vector<1x128xf32>
    %158 = vector.shape_cast %157 : vector<1x128xf32> to vector<128xf32>
    %159 = vector.shape_cast %156 : vector<128xf32> to vector<1x128xf32>
    tpu.vector_store %arg3[%c10_26, %c0_27], %159 {strides = array<i32>} : memref<11x128xf32, #tpu.memory_space<vmem>>, vector<1x128xf32>,
    return
  }
  func.func @transform_0(%arg0: i32, %arg1: memref<33xf32, #tpu.memory_space<smem>>) -> (i32, i32) {
    %c0_i32 = arith.constant 0 : i32
    %c0_i32_0 = arith.constant 0 : i32
    return %c0_i32, %arg0 : i32, i32
  }
  func.func @transform_1(%arg0: i32, %arg1: memref<33xf32, #tpu.memory_space<smem>>) -> (i32, i32) {
    %c0_i32 = arith.constant 0 : i32
    %c0_i32_0 = arith.constant 0 : i32
    return %c0_i32, %arg0 : i32, i32
  }
}

</mosaic_0001>

<bundles_post_ra>
// kernel: tpu_custom_call.1
= control target key start
LH: loop header
LB: loop body
LE: loop exit
PB: predicated region body
PF: predicated region fallthrough
CT: control target
= control target key end

     0   :  { %s892_s0 = inlined_call_operand.hbm [shape: f32[33], index: 0, kind: input, shape index: {}]   ;;  %s893_s1 = inlined_call_operand.hbm [shape: f32[3,256], index: 1, kind: input, shape index: {}]   ;;  %s894_s2 = inlined_call_operand.hbm [shape: f32[11,256], index: 2, kind: output, shape index: {}]  }
   0x1   :  { %s452_s11 = scalar_lea.hbm %s892_s0, 16 }
   0x2   :  { %p453_p0 = scmp.ne.s32.totalorder %s892_s0, %s452_s11  ;;  %p456_p1 = scmp.lt.u32.totalorder %s452_s11, %s892_s0 }
   0x4   :  { %p458_p2 = pnand %p456_p1, %p453_p0 }
   0x6   :  { %461 = shalt.err (!%p458_p2)  }
   0x7   :  { %s562_s16 = smov [#allocation3]  }
   0x8   :  { %8 = dma.hbm_to_smem %s892_s0, 16, %s562_s16, [#allocation2] }
   0x9   :  { %536 = dma.done.wait [#allocation2], 16 }
   0xa   :  { %537 = vsyncadd [#allocation2], 4294967280 }
   0xb   :  { %10 = sfence }
   0xc   :  { %11 = vsyncpa [#allocation5], 0 }
   0xd   :  { %13 = vsyncpa [#allocation5 + $0x1], 0 }
   0xe   :  { %14 = vsyncpa [#allocation6], 0 }
   0xf   :  { %16 = vsyncpa [#allocation6 + $0x1], 0  ;;  %s595_s19 = smov 0   ;;  %s597_s20 = smov 0  }
  0x10   :  { %s599_s21 = smov 0   ;;  %s601_s22 = smov 0  }
  0x11 LB: > { %s616_s0 = sadd.s32 4294967295, %s560_s22   ;;  %s358_s23 = sadd.s32 4294967294, %s560_s22   ;;  %s560_s22 = sphi %s601_s22, %s909_s22   ;;  %s556_s21 = sphi %s599_s21, %s908_s21   ;;  %s552_s20 = sphi %s597_s20, %s907_s20   ;;  %s548_s19 = sphi %s595_s19, %s906_s19  }
  0x12   : > { %s620_s24 = sadd.s32 1, %s560_s22   ;;  %s29_s25 = sadd.s32 1, %s556_s21 }
  0x13   : > { %s26_s26 = ssub.s32 %s560_s22, %s620_s24  ;;  %p36_p3 = scmp.ne.s32.totalorder %s556_s21, %s552_s20 }
  0x14   : > { %p27_p4 = scmp.eq.s32.totalorder %s26_s26, 0  ;;  %p37_p5 = scmp.eq.s32.totalorder %s560_s22, 0 }
  0x15   : > { %p42_p6 = scmp.ne.s32.totalorder %s552_s20, %s548_s19  ;;  %p43_p7 = scmp.eq.s32.totalorder %s616_s0, 0 }
  0x16   : > { %s632_s27 = scalar_select %p27_p4, %s556_s21, %s29_s25  }
  0x17   : > { %p634_p8 = por %p37_p5, %p36_p3  ;;  %p638_p9 = por %p43_p7, %p42_p6 }
  0x18   : > { %p66_p10 = scmp.eq.s32.totalorder %s616_s0, 1  ;;  %p72_p11 = scmp.eq.s32.totalorder %s358_s23, 1 }
  0x19   : > { %p414_p13 = scmp.lt.s32.totalorder %s560_s22, 2  ;;  %s92_s4 = sand.u32 1, %s556_s21  }
  0x1a   : > { %p645_p0 = por %p66_p10, %p36_p3  ;;  %p649_p1 = por %p72_p11, %p42_p6 }
  0x1b   : > { %s362_s5 = sshll.u32 %s560_s22, 6  ;;  %s361_s6 = sshll.u32 %s92_s4, 2 }
  0x1c   : > { %s898_s30 = scalar_select %p645_p0, 1, 0 }
  0x1d   : > { %s899_s3 = scalar_select %p649_p1, 1, 0 }
  0x1e   : > { %s658_s9 = scalar_lea.hbm %s893_s1, %s362_s5  ;;  %s96_s10 = scalar_lea.vmem [#allocation4], %s361_s6 }
  0x1f   : > { %s103_s11 = sshll.u32 %s96_s10, 4  ;;  %p662_p2 = pnand %p414_p13, %p634_p8  ;;  %s666_s11 = int_to_ptr.vmem [resolvable:$true] %s103_s11 }
  0x20   : > { %s93_s13 = scalar_lea.sflag [#allocation5], %s92_s4  ;;  %s462_s14 = scalar_lea.hbm %s658_s9, 64 }
  0x21   : > { %p463_p5 = scmp.ne.s32.totalorder %s658_s9, %s462_s14  ;;  %p464_p6 = pneg %p662_p2 }
  0x22   : > { %s467_s17 = scalar_lea.hbm %s893_s1, 128  ;;  %p468_p8 = scmp.lt.u32.totalorder %s658_s9, %s893_s1 }
  0x23   : > { %p465_p7 = pnand %p464_p6, %p463_p5  ;;  %p469_p11 = scmp.lt.u32.totalorder %s467_s17, %s462_s14 }
  0x24   : > { %p471_p12 = scmp.lt.u32.totalorder %s462_s14, %s658_s9 }
  0x25   : > { %p466_p10 = pneg %p465_p7  ;;  %p470_p13 = por %p469_p11, %p468_p8 }
  0x27   : > { %p472_p3 = por %p471_p12, %p470_p13 }
  0x29   : > { %p473_p4 = pnand %p472_p3, %p466_p10 }
  0x2b   : > { %476 = shalt.err (!%p473_p4)
}
  0x2c   : > { %s477_s25 = scalar_lea.vmem %s666_s11, 64  ;;  %s563_s26 = smov [#allocation4]  }
  0x2d   : > { %p478_p5 = scmp.ne.s32.totalorder %s666_s11, %s477_s25  ;;  %s482_s28 = sshll.u32 %s563_s26, 4  ;;  %s483_s28 = int_to_ptr.vmem [resolvable:$false] %s482_s28 }
  0x2e   : > { %s484_s4 = scalar_lea.vmem %s483_s28, 128  ;;  %p485_p0 = scmp.lt.s32.totalorder %s666_s11, %s483_s28 }
  0x2f   : > { %p480_p7 = pnand %p478_p5, %p464_p6  ;;  %p486_p8 = scmp.lt.s32.totalorder %s484_s4, %s477_s25 }
  0x31   : > { %p481_p1 = pneg %p480_p7  ;;  %p487_p11 = por %p486_p8, %p485_p0 }
  0x33   : > { %p488_p12 = pnand %p487_p11, %p481_p1 }
  0x35   : > { %491 = shalt.err (!%p488_p12)
}
  0x36   : > { %409 = dma.hbm_to_vmem [thread:$0]  (!%p662_p2), %s658_s9, 64, %s666_s11, %s93_s13  }
  0x37   : > { %p901_p3 = scmp.lt.s32.totalorder %s560_s22, 3  ;;  %p902_p4 = scmp.ge.s32.totalorder %s560_s22, 1 }
  0x39   : > { %p109_p6 = pnand %p902_p4, %p901_p3 }
  0x3a   : > { %s700_s5 = sand.u32 (!%p109_p6), 1, %s552_s20  }
  0x3b   : > { %112 = sbr.rel (%p109_p6) target bundleno = 116 (0x74), region = 24  ;;  %s364_s6 = sshll.u32 (!%p109_p6), %s700_s5, 2 }
  0x3c   : > { %s115_s7 = scalar_lea.sflag (!%p109_p6), [#allocation5], %s700_s5  ;;  %s118_s8 = scalar_lea.vmem (!%p109_p6), [#allocation4], %s364_s6 }
  0x42   : > { %539 = dma.done.wait (%p638_p9), %s115_s7, 64  }
  0x43   : > { %541 = vsyncadd (%p638_p9), %s115_s7, 4294967232  ;;  %s365_s9 = sshll.u32 %s700_s5, 4  ;;  %s140_s10 = sld [smem:[#allocation3]]  ;;  %v713_v0 = vld [vmem:[%s118_s8] sm:$0x1] }
  0x44   : > { %s366_s11 = sld [smem:[#allocation3 + $0x1]]  ;;  %s367_s12 = sld [smem:[#allocation3 + $0x2]]  ;;  %v715_v1 = vld [vmem:[%s118_s8 + $0x1] sm:$0x1]  ;;  %v717_v2 = vld [vmem:[%s118_s8 + $0x2] sm:$0x1] }
  0x45   : > { %s368_s13 = sld [smem:[#allocation3 + $0x3]]  ;;  %s369_s14 = sld [smem:[#allocation3 + $0x4]] }
  0x46   : > { %s370_s15 = sld [smem:[#allocation3 + $0x5]]  ;;  %s371_s16 = sld [smem:[#allocation3 + $0x6]] }
  0x47   : > { %s709_s17 = sld [smem:[#allocation3 + $0x7]]  ;;  %s711_s18 = sld [smem:[#allocation3 + $0x8]] }
  0x48   : > { %s720_s29 = sld [smem:[#allocation3 + $0x9]]  ;;  %s722_s23 = sld [smem:[#allocation3 + $0xa]] }
  0x49   : > { %v141_v3 = vstv %s140_s10  ;;  %s726_s25 = sld [smem:[#allocation3 + $0xb]]  ;;  %s728_s26 = sld [smem:[#allocation3 + $0xc]] }
  0x4a   : > { %v142_v4 = vmul.f32 %v141_v3, %v713_v0  ;;  %v144_v5 = vstv %s366_s11  ;;  %v148_v6 = vstv %s367_s12  ;;  %s731_s28 = sld [smem:[#allocation3 + $0xd]]  ;;  %s733_s4 = sld [smem:[#allocation3 + $0xe]] }
  0x4b   : > { %v145_v7 = vmul.f32 %v144_v5, %v715_v1  ;;  %v149_v8 = vmul.f32 %v148_v6, %v717_v2  ;;  %v153_v9 = vstv %s368_s13  ;;  %v156_v11 = vstv %s369_s14  ;;  %s736_s6 = sld [smem:[#allocation3 + $0xf]]  ;;  %s738_s7 = sld [smem:[#allocation3 + $0x10]] }
  0x4c   : > { %v154_v10 = vmul.f32 %v153_v9, %v713_v0  ;;  %v157_v13 = vmul.f32 %v156_v11, %v715_v1  ;;  %v160_v14 = vstv %s370_s15  ;;  %v165_v15 = vstv %s371_s16  ;;  %s744_s8 = sld [smem:[#allocation3 + $0x11]]  ;;  %s746_s10 = sld [smem:[#allocation3 + $0x12]] }
  0x4d   : > { %v146_v12 = vadd.f32 %v145_v7, %v142_v4  ;;  %v161_v16 = vmul.f32 %v160_v14, %v717_v2  ;;  %v166_v17 = vmul.f32 %v165_v15, %v713_v0  ;;  %v168_v18 = vstv %s709_s17  ;;  %s750_s11 = sld [smem:[#allocation3 + $0x13]]  ;;  %s752_s12 = sld [smem:[#allocation3 + $0x14]] }
  0x4e   : > { %v172_v19 = vstv %s711_s18  ;;  %v158_v21 = vadd.f32 %v157_v13, %v154_v10  ;;  %v169_v22 = vmul.f32 %v168_v18, %v715_v1  ;;  %v177_v24 = vstv %s720_s29  ;;  %s756_s13 = sld [smem:[#allocation3 + $0x15]]  ;;  %s758_s14 = sld [smem:[#allocation3 + $0x16]] }
  0x4f   : > { %v150_v20 = vadd.f32 %v149_v8, %v146_v12  ;;  %v173_v23 = vmul.f32 %v172_v19, %v717_v2  ;;  %v180_v25 = vstv %s722_s23  ;;  %s762_s15 = scalar_lea.vmem [#allocation7], %s365_s9  ;;  %v178_v28 = vmul.f32 %v177_v24, %v713_v0  ;;  %s767_s16 = sld [smem:[#allocation3 + $0x17]] }
  0x50   : > { %v162_v26 = vadd.f32 %v161_v16, %v158_v21  ;;  %v170_v27 = vadd.f32 %v169_v22, %v166_v17  ;;  %v181_v29 = vmul.f32 %v180_v25, %v715_v1  ;;  %s769_s17 = sld [smem:[#allocation3 + $0x18]]  ;;  %v184_v30 = vstv %s726_s25  ;;  %s775_s9 = sld [smem:[#allocation3 + $0x19]] }
  0x51   : > { %151 = vst [vmem:[%s762_s15] sm:$0x1] %v150_v20  ;;  %v189_v31 = vstv %s728_s26  ;;  %v192_v32 = vstv %s731_s28  ;;  %v196_v33 = vstv %s733_s4  ;;  %s777_s18 = sld [smem:[#allocation3 + $0x1a]]  ;;  %v185_v36 = vmul.f32 %v184_v30, %v717_v2  ;;  %s786_s29 = sld [smem:[#allocation3 + $0x1b]] }
  0x52   : > { %163 = vst [vmem:[%s762_s15 + $0x1] sm:$0x1] %v162_v26  ;;  %v174_v34 = vadd.f32 %v173_v23, %v170_v27  ;;  %v182_v35 = vadd.f32 %v181_v29, %v178_v28  ;;  %v190_v37 = vmul.f32 %v189_v31, %v713_v0  ;;  %v193_v38 = vmul.f32 %v192_v32, %v715_v1  ;;  %s788_s23 = sld [smem:[#allocation3 + $0x1c]]  ;;  %s794_s25 = sld [smem:[#allocation3 + $0x1d]] }
  0x53   : > { %v197_v39 = vmul.f32 %v196_v33, %v717_v2  ;;  %v201_v40 = vstv %s736_s6  ;;  %v204_v41 = vstv %s738_s7  ;;  %v208_v45 = vstv %s744_s8  ;;  %s799_s26 = sld [smem:[#allocation3 + $0x1e]]  ;;  %s801_s28 = sld [smem:[#allocation3 + $0x1f]] }
  0x54   : > { %175 = vst [vmem:[%s762_s15 + $0x2] sm:$0x1] %v174_v34  ;;  %v186_v42 = vadd.f32 %v185_v36, %v182_v35  ;;  %v202_v43 = vmul.f32 %v201_v40, %v713_v0  ;;  %v205_v44 = vmul.f32 %v204_v41, %v715_v1  ;;  %v194_v46 = vadd.f32 %v193_v38, %v190_v37  ;;  %s807_s4 = sld [smem:[#allocation3 + $0x20]]  ;;  %s285_s6 = sshll.u32 %s762_s15, 4  ;;  %s840_s6 = int_to_ptr.vmem [resolvable:$true] %s285_s6 }
  0x55   : > { %v209_v47 = vmul.f32 %v208_v45, %v717_v2  ;;  %v213_v48 = vstv %s746_s10  ;;  %v216_v49 = vstv %s750_s11  ;;  %v220_v53 = vstv %s752_s12  ;;  %s399_s7 = sshll.u32 %s616_s0, 7  ;;  %s273_s0 = scalar_lea.sflag [#allocation6], %s700_s5 }
  0x56   : > { %187 = vst [vmem:[%s762_s15 + $0x3] sm:$0x1] %v186_v42  ;;  %v206_v50 = vadd.f32 %v205_v44, %v202_v43  ;;  %v214_v51 = vmul.f32 %v213_v48, %v713_v0  ;;  %v217_v52 = vmul.f32 %v216_v49, %v715_v1  ;;  %v198_v54 = vadd.f32 %v197_v39, %v194_v46  ;;  %s846_s11 = scalar_lea.hbm %s894_s2, %s399_s7  ;;  %s492_s12 = scalar_lea.vmem %s840_s6, 256 }
  0x57   : > { %v221_v55 = vmul.f32 %v220_v53, %v717_v2  ;;  %v225_v56 = vstv %s756_s13  ;;  %v228_v57 = vstv %s758_s14  ;;  %v232_v62 = vstv %s767_s16  ;;  %p493_p9 = scmp.ne.s32.totalorder %s840_s6, %s492_s12  ;;  %p903_p0 = scmp.ne.s32.totalorder %s898_s30, 0 }
  0x58   : > { %v210_v58 = vadd.f32 %v209_v47, %v206_v50  ;;  %v218_v59 = vadd.f32 %v217_v52, %v214_v51  ;;  %v226_v60 = vmul.f32 %v225_v56, %v713_v0  ;;  %v229_v61 = vmul.f32 %v228_v57, %v715_v1  ;;  %199 = vst [vmem:[%s762_s15 + $0x4] sm:$0x1] %v198_v54  ;;  %s564_s13 = smov [#allocation7]  }
  0x59   : > { %v237_v63 = vstv %s769_s17  ;;  %v240_v3 = vstv %s775_s9  ;;  %v244_v4 = vstv %s777_s18  ;;  %v233_v7 = vmul.f32 %v232_v62, %v717_v2  ;;  %p494_p1 = pnand %p493_p9, %p903_p0  ;;  %s496_s14 = sshll.u32 %s564_s13, 4  ;;  %s497_s14 = int_to_ptr.vmem [resolvable:$false] %s496_s14 }
  0x5a   : > { %211 = vst [vmem:[%s762_s15 + $0x5] sm:$0x1] %v210_v58  ;;  %v222_v5 = vadd.f32 %v221_v55, %v218_v59  ;;  %v230_v6 = vadd.f32 %v229_v61, %v226_v60  ;;  %v238_v8 = vmul.f32 %v237_v63, %v713_v0  ;;  %v241_v9 = vmul.f32 %v240_v3, %v715_v1  ;;  %s498_s16 = scalar_lea.vmem %s497_s14, 512  ;;  %p499_p10 = scmp.lt.s32.totalorder %s840_s6, %s497_s14 }
  0x5b   : > { %v245_v10 = vmul.f32 %v244_v4, %v717_v2  ;;  %v249_v11 = vstv %s786_s29  ;;  %v252_v12 = vstv %s788_s23  ;;  %v256_v16 = vstv %s794_s25  ;;  %p495_p2 = pneg %p494_p1  ;;  %p500_p13 = scmp.lt.s32.totalorder %s498_s16, %s492_s12 }
  0x5c   : > { %223 = vst [vmem:[%s762_s15 + $0x6] sm:$0x1] %v222_v5  ;;  %v234_v13 = vadd.f32 %v233_v7, %v230_v6  ;;  %v250_v14 = vmul.f32 %v249_v11, %v713_v0  ;;  %v253_v15 = vmul.f32 %v252_v12, %v715_v1  ;;  %v242_v17 = vadd.f32 %v241_v9, %v238_v8 }
  0x5d   : > { %v257_v18 = vmul.f32 %v256_v16, %v717_v2  ;;  %v261_v19 = vstv %s799_s26  ;;  %v264_v20 = vstv %s801_s28  ;;  %v268_v24 = vstv %s807_s4  ;;  %p501_p5 = por %p500_p13, %p499_p10 }
  0x5e   : > { %235 = vst [vmem:[%s762_s15 + $0x7] sm:$0x1] %v234_v13  ;;  %v254_v21 = vadd.f32 %v253_v15, %v250_v14  ;;  %v262_v22 = vmul.f32 %v261_v19, %v713_v0  ;;  %v265_v23 = vmul.f32 %v264_v20, %v715_v1  ;;  %v246_v25 = vadd.f32 %v245_v10, %v242_v17 }
  0x5f   : > { %v269_v26 = vmul.f32 %v268_v24, %v717_v2  ;;  %p502_p7 = pnand %p501_p5, %p495_p2 }
  0x60   : > { %v258_v27 = vadd.f32 %v257_v18, %v254_v21  ;;  %v266_v28 = vadd.f32 %v265_v23, %v262_v22  ;;  %247 = vst [vmem:[%s762_s15 + $0x8] sm:$0x1] %v246_v25 }
  0x62   : > { %259 = vst [vmem:[%s762_s15 + $0x9] sm:$0x1] %v258_v27  ;;  %v270_v0 = vadd.f32 %v269_v26, %v266_v28 }
  0x64   : > { %271 = vst [vmem:[%s762_s15 + $0xa] sm:$0x1] %v270_v0 }
  0x65   : > { %505 = shalt.err (!%p502_p7)
}
  0x66   : > { %s506_s15 = scalar_lea.hbm %s846_s11, 256  ;;  %s510_s18 = scalar_lea.hbm %s894_s2, 512 }
  0x67   : > { %p507_p8 = scmp.ne.s32.totalorder %s846_s11, %s506_s15  ;;  %p511_p3 = scmp.lt.u32.totalorder %s846_s11, %s894_s2 }
  0x68   : > { %p512_p4 = scmp.lt.u32.totalorder %s510_s18, %s506_s15  ;;  %p514_p9 = scmp.lt.u32.totalorder %s506_s15, %s846_s11 }
  0x69   : > { %p508_p11 = pnand %p507_p8, %p903_p0 }
  0x6a   : > { %p513_p6 = por %p512_p4, %p511_p3 }
  0x6b   : > { %p509_p12 = pneg %p508_p11 }
  0x6c   : > { %p515_p1 = por %p514_p9, %p513_p6 }
  0x6e   : > { %p516_p2 = pnand %p515_p1, %p509_p12 }
  0x70   : > { %519 = shalt.err (!%p516_p2)
}
  0x71   : > { %s565_s25 = smov 128   ;;  %s566_s26 = smov 256  }
  0x72   : > { %s567_s28 = smov 8  }
  0x73   : > { %404 = dma.vmem_to_hbm [thread:$0]  (%p903_p0), %s840_s6, 256, %s846_s11, %s273_s0, %s565_s25, %s566_s26, %s567_s28  }
  0x74 PF: > { %s300_s4 = sand.u32 1, %s548_s19   ;;  %p904_p10 = scmp.ne.s32.totalorder %s899_s3, 0 }
  0x75   : > { %p905_p13 = scmp.ge.s32.totalorder %s560_s22, 2  ;;  %s301_s7 = scalar_lea.sflag [#allocation6], %s300_s4 }
  0x77   : > { %p411_p5 = pnand %p905_p13, %p904_p10 }
  0x79   : > { %543 = dma.done.wait (!%p411_p5), %s301_s7, 256  }
  0x7a   : > { %545 = vsyncadd (!%p411_p5), %s301_s7, 4294967040  ;;  %p19_p7 = scmp.ge.s32.totalorder %s620_s24, 4   ;;  %s906_s19 = smov %s552_s20 }
  0x7b   : > { %s907_s20 = smov %s556_s21  ;;  %s908_s21 = smov %s632_s27 }
  0x7c   : > { %s909_s22 = smov %s620_s24  ;;  %21 = sbr.rel (!%p19_p7) target bundleno = 17 (0x11), region = 69 }
  0x83   :  { %306 = vsyncpa [#allocation5], 1 }
  0x84   :  { %308 = vsyncpa [#allocation5 + $0x1], 1 }
  0x85   :  { %309 = vsyncpa [#allocation6], 1 }
  0x86   :  { %311 = vsyncpa [#allocation6 + $0x1], 1 }

</bundles_post_ra>
